<compile_context>
chip_gen: v5e
topology: v5e:2x2
jax: 0.10.0
libtpu: 0.0.40
codegen_flags: <defaults>
</compile_context>

<pallas_src>
import jax
import jax.numpy as jnp
import numpy as np
from jax.experimental import pallas as pl
from jax.experimental.pallas import tpu as pltpu


def _round_up(a: int, m: int) -> int:
    return (a + m - 1) // m * m


def _cdiv(a: int, b: int) -> int:
    return -(-a // b)


# ----------------------------------------------------------------------------
# Deterministic synthetic "audfilters": complex modulated Hann windows.
# TODO(synk): exact ERB-scale filter construction (audfilters / tighten / fit)
#             not reproduced; synthetic modulated windows used instead.
# ----------------------------------------------------------------------------
def make_isac_kernels(kernel_size: int, num_channels: int, fs: int):
    k = np.arange(kernel_size, dtype=np.float64) - kernel_size / 2.0
    window = 0.5 - 0.5 * np.cos(
        2.0 * np.pi * np.arange(kernel_size, dtype=np.float64) / kernel_size
    )
    fc = np.linspace(100.0, 0.45 * fs, num_channels)
    phase = 2.0 * np.pi * fc[:, None] * k[None, :] / fs
    kers = window[None, :] * np.exp(1j * phase)
    kers = kers / np.sqrt(kernel_size)
    k_real = jnp.asarray(kers.real, dtype=jnp.float32)   # (C, K)
    k_imag = jnp.asarray(kers.imag, dtype=jnp.float32)   # (C, K)
    return k_real, k_imag


# ----------------------------------------------------------------------------
# Pallas kernel: one (batch, time-tile) block.
#   chunk_ref  : (stride, T_tile + Q) f32  polyphase signal rows
#                chunk[r, u] = x_ext[(tile_start + u)*stride + r]
#   kf_ref     : (2*Cp, Kp)            f32  fused real(top)/imag(bottom) filters
#   out_r_ref  : (Cp, T_tile)          f32  real filterbank output
#   out_i_ref  : (Cp, T_tile)          f32  imag filterbank output
#   frames_ref : (Kp, T_tile)          f32  VMEM scratch (assembled frames)
#
# frames[q*stride + r, t] = chunk[r, t + q]  ==  x_ext[(tile_start+t)*stride + k]
# out = kf @ frames      (single matmul, contraction depth Kp)
# ----------------------------------------------------------------------------
def _isac_fb_kernel(chunk_ref, kf_ref, out_r_ref, out_i_ref, frames_ref):
    stride = chunk_ref.shape[0]
    t_tile = out_r_ref.shape[-1]
    cp = out_r_ref.shape[0]
    kp = frames_ref.shape[0]
    n_phase = kp // stride

    chunk = chunk_ref[...]                               # (stride, t_tile + Q)

    # In-VMEM frame assembly: Q shifted copies (done once, outside the matmul).
    for q in range(n_phase):                             # static unroll, Q small
        frames_ref[q * stride:(q + 1) * stride, :] = chunk[:, q:q + t_tile]

    # One full-depth matmul producing both real and imag halves.
    res = jnp.dot(kf_ref[...], frames_ref[...],
                  preferred_element_type=jnp.float32)    # (2*Cp, T_tile)

    out_r_ref[...] = res[:cp, :]                         # sublane-aligned splits
    out_i_ref[...] = res[cp:, :]


def isac_forward(x, kernels_real, kernels_imag, stride, *, time_tile=1024):
    """x: (B, 1, L) float32 -> (B, C, T_out) complex64 (matches ISAC.forward)."""
    B, in_ch, L = x.shape
    assert in_ch == 1
    C, K = kernels_real.shape
    pad = K // 2
    assert pad <= L, "circular padding requires kernel_size//2 <= signal length"
    L_pad = L + 2 * pad
    T_out = (L_pad - K) // stride + 1

    # ---- static tiling parameters ------------------------------------------
    Kp = _round_up(K, stride)          # taps padded to a multiple of the stride
    n_phase = Kp // stride             # Q
    Cp = _round_up(C, 8)               # sublane-friendly channel padding
    C2 = 2 * Cp                        # fused real+imag rows of the filter

    T_tile = min(_round_up(time_tile, 128), _round_up(T_out, 128))  # lane-dense
    n_tiles = _cdiv(T_out, T_tile)
    # v7x has two TensorCores: best-effort even grid size when B is odd.
    if (B * n_tiles) % 2 == 1 and T_out > 128:
        t_alt = _round_up(_cdiv(T_out, n_tiles + 1), 128)
        n_alt = _cdiv(T_out, t_alt)
        if (B * n_alt) % 2 == 0:
            T_tile, n_tiles = t_alt, n_alt
    T_padded = n_tiles * T_tile

    # ---- fused, zero-padded filter bank: rows [0:C)=real, [Cp:Cp+C)=imag ----
    kf = jnp.zeros((C2, Kp), jnp.float32)
    kf = kf.at[:C, :K].set(kernels_real.astype(jnp.float32))
    kf = kf.at[Cp:Cp + C, :K].set(kernels_imag.astype(jnp.float32))

    # ---- polyphase chunks WITHOUT any gather HLO ----------------------------
    # chunk[b, j, r, u] = x_ext[b, (j*T_tile + u)*stride + r]
    x1 = x[:, 0, :].astype(jnp.float32)                                # (B, L)
    x_pad = jnp.concatenate([x1[:, L - pad:], x1, x1[:, :pad]], axis=-1)  # circular
    W_total = T_padded + n_phase
    N_ext = W_total * stride
    assert N_ext >= L_pad
    x_ext = jnp.pad(x_pad, ((0, 0), (0, N_ext - L_pad)))               # zero tail
    poly = x_ext.reshape(B, W_total, stride).transpose(0, 2, 1)        # (B, s, W)
    if n_tiles == 1:
        chunks = poly[:, None, :, :]
    else:
        chunks = jnp.stack(
            [poly[:, :, j * T_tile: j * T_tile + T_tile + n_phase]
             for j in range(n_tiles)], axis=1)    # (B, n_tiles, stride, T_tile+Q)

    # ---- VMEM budget (double-buffered blocks + scratch) & cost hint ---------
    block_bytes = 4 * (
        2 * _round_up(stride, 8) * _round_up(T_tile + n_phase, 128)   # chunk x2
        + 2 * C2 * _round_up(Kp, 128)                                  # filters x2
        + _round_up(Kp, 8) * T_tile                                    # frames scratch
        + 2 * 2 * Cp * T_tile)                                         # 2 outputs x2
    vmem_limit = int(min(max(2 * block_bytes, 16 << 20), 48 << 20))
    flops = int(2 * B * n_tiles * C2 * T_tile * Kp)
    bytes_accessed = int(chunks.size * 4 + kf.size * 4 + 2 * B * Cp * T_padded * 4)

    out_r, out_i = pl.pallas_call(
        _isac_fb_kernel,
        out_shape=(jax.ShapeDtypeStruct((B, Cp, T_padded), jnp.float32),
                   jax.ShapeDtypeStruct((B, Cp, T_padded), jnp.float32)),
        grid_spec=pltpu.PrefetchScalarGridSpec(
            num_scalar_prefetch=0,
            grid=(B, n_tiles),
            in_specs=[
                # per-(batch, tile) polyphase chunk; last two block dims equal
                # the full array dims -> satisfies the (8,128) layout rule.
                pl.BlockSpec(
                    (pl.Squeezed(), pl.Squeezed(), stride, T_tile + n_phase),
                    lambda b, j: (b, j, 0, 0)),
                # constant fused filters (same block every grid step)
                pl.BlockSpec((C2, Kp), lambda b, j: (0, 0)),
            ],
            out_specs=[
                pl.BlockSpec((pl.Squeezed(), Cp, T_tile), lambda b, j: (b, 0, j)),
                pl.BlockSpec((pl.Squeezed(), Cp, T_tile), lambda b, j: (b, 0, j)),
            ],
            scratch_shapes=[pltpu.VMEM((Kp, T_tile), jnp.float32)],
        ),
        compiler_params=pltpu.CompilerParams(
            dimension_semantics=("parallel", "parallel"),
            vmem_limit_bytes=vmem_limit),
        cost_estimate=pl.CostEstimate(
            flops=flops, transcendentals=0, bytes_accessed=bytes_accessed),
    )(chunks, kf)

    # Planar -> complex64 once (required by the module's forward signature).
    res_r = out_r[:, :C, :T_out]
    res_i = out_i[:, :C, :T_out]
    return jax.lax.complex(res_r, res_i)


# Pure-JAX reference (mirrors F.conv1d on the circularly padded signal).
def isac_forward_ref(x, kernels_real, kernels_imag, stride):
    B, _, L = x.shape
    C, K = kernels_real.shape
    pad = K // 2
    x1 = x[:, 0, :]
    x_pad = jnp.concatenate([x1[:, L - pad:], x1, x1[:, :pad]], axis=-1)
    T_out = (L + 2 * pad - K) // stride + 1
    idx = jnp.arange(T_out)[:, None] * stride + jnp.arange(K)[None, :]
    frames = x_pad[:, idx]                                        # (B, T_out, K)
    out_r = jnp.einsum("btk,ck->bct", frames, kernels_real)
    out_i = jnp.einsum("btk,ck->bct", frames, kernels_imag)
    return out_r + 1j * out_i


if __name__ == "__main__":
    # Small shapes consistent with the module's forward
    kernel_size = 16
    num_channels = 8
    stride = 4
    fs = 16000
    batch = 2
    L = 64

    k_real, k_imag = make_isac_kernels(kernel_size, num_channels, fs)

    key = jax.random.PRNGKey(0)
    x = jax.random.normal(key, (batch, 1, L), dtype=jnp.float32)

    out = isac_forward(x, k_real, k_imag, stride)
    out = jax.block_until_ready(out)

    ref = isac_forward_ref(x, k_real, k_imag, stride)
    assert out.shape == ref.shape == (batch, num_channels, L // stride + 1)
    assert out.dtype == jnp.complex64
    np.testing.assert_allclose(np.asarray(out.real), np.asarray(ref.real),
                               rtol=1e-5, atol=1e-5)
    np.testing.assert_allclose(np.asarray(out.imag), np.asarray(ref.imag),
                               rtol=1e-5, atol=1e-5)

    print("KERNEL_OK")
</pallas_src>

<mosaic_0001>
module attributes {stable_mosaic.version = 11 : i64} {
  func.func @_isac_fb_kernel(%arg0: i32, %arg1: i32, %arg2: memref<1x1x4x132xf32, #tpu.memory_space<vmem>>, %arg3: memref<16x16xf32, #tpu.memory_space<vmem>>, %arg4: memref<1x8x128xf32, #tpu.memory_space<vmem>>, %arg5: memref<1x8x128xf32, #tpu.memory_space<vmem>>, %arg6: memref<16x128xf32, #tpu.memory_space<vmem>>) attributes {dimension_semantics = [#tpu.dimension_semantics<parallel>, #tpu.dimension_semantics<parallel>], iteration_bounds = array<i64: 2, 1>, scalar_prefetch = 0 : i64, scratch_operands = 1 : i64, tpu.core_type = #tpu.core_type<tc>, window_params = [{transform_indices = @transform_0, window_bounds = array<i64: 1, 1, 4, 132>}, {pipeline_mode = #tpu.pipeline_mode<synchronous>, transform_indices = @transform_1, window_bounds = array<i64: 16, 16>}, {transform_indices = @transform_2, window_bounds = array<i64: 1, 8, 128>}, {transform_indices = @transform_3, window_bounds = array<i64: 1, 8, 128>}]} {
    %c0 = arith.constant 0 : index
    %c0_0 = arith.constant 0 : index
    %c0_1 = arith.constant 0 : index
    %c0_2 = arith.constant 0 : index
    %0 = vector.load %arg2[%c0, %c0_0, %c0_1, %c0_2] : memref<1x1x4x132xf32, #tpu.memory_space<vmem>>, vector<1x1x4x132xf32>
    %1 = vector.shape_cast %0 : vector<1x1x4x132xf32> to vector<4x132xf32>
    %2 = vector.extract_strided_slice %1 {offsets = [0, 0], sizes = [4, 128], strides = [1, 1]} : vector<4x132xf32> to vector<4x128xf32>
    %c0_3 = arith.constant 0 : index
    %c0_4 = arith.constant 0 : index
    %3 = vector.load %arg6[%c0_3, %c0_4] : memref<16x128xf32, #tpu.memory_space<vmem>>, vector<4x128xf32>
    tpu.vector_store %arg6[%c0_3, %c0_4], %2 {strides = array<i32>} : memref<16x128xf32, #tpu.memory_space<vmem>>, vector<4x128xf32>,
    %4 = vector.extract_strided_slice %1 {offsets = [0, 1], sizes = [4, 128], strides = [1, 1]} : vector<4x132xf32> to vector<4x128xf32>
    %c4 = arith.constant 4 : index
    %c0_5 = arith.constant 0 : index
    %5 = vector.load %arg6[%c4, %c0_5] : memref<16x128xf32, #tpu.memory_space<vmem>>, vector<4x128xf32>
    tpu.vector_store %arg6[%c4, %c0_5], %4 {strides = array<i32>} : memref<16x128xf32, #tpu.memory_space<vmem>>, vector<4x128xf32>,
    %6 = vector.extract_strided_slice %1 {offsets = [0, 2], sizes = [4, 128], strides = [1, 1]} : vector<4x132xf32> to vector<4x128xf32>
    %c8 = arith.constant 8 : index
    %c0_6 = arith.constant 0 : index
    %7 = vector.load %arg6[%c8, %c0_6] : memref<16x128xf32, #tpu.memory_space<vmem>>, vector<4x128xf32>
    tpu.vector_store %arg6[%c8, %c0_6], %6 {strides = array<i32>} : memref<16x128xf32, #tpu.memory_space<vmem>>, vector<4x128xf32>,
    %8 = vector.extract_strided_slice %1 {offsets = [0, 3], sizes = [4, 128], strides = [1, 1]} : vector<4x132xf32> to vector<4x128xf32>
    %c12 = arith.constant 12 : index
    %c0_7 = arith.constant 0 : index
    %9 = vector.load %arg6[%c12, %c0_7] : memref<16x128xf32, #tpu.memory_space<vmem>>, vector<4x128xf32>
    tpu.vector_store %arg6[%c12, %c0_7], %8 {strides = array<i32>} : memref<16x128xf32, #tpu.memory_space<vmem>>, vector<4x128xf32>,
    %c0_8 = arith.constant 0 : index
    %c0_9 = arith.constant 0 : index
    %10 = vector.load %arg3[%c0_8, %c0_9] : memref<16x16xf32, #tpu.memory_space<vmem>>, vector<16x16xf32>
    %c0_10 = arith.constant 0 : index
    %c0_11 = arith.constant 0 : index
    %11 = vector.load %arg6[%c0_10, %c0_11] : memref<16x128xf32, #tpu.memory_space<vmem>>, vector<16x128xf32>
    %cst = arith.constant dense<0.000000e+00> : vector<16x128xf32>
    %12 = tpu.matmul %10, %11, %cst {dimension_numbers = #tpu.dot_dimension_numbers<[1], [0], [0], [1], [0, 0, 1, 1], [], []>} : vector<16x16xf32>, vector<16x128xf32>, vector<16x128xf32> -> vector<16x128xf32>
    %13 = vector.extract_strided_slice %12 {offsets = [0, 0], sizes = [8, 128], strides = [1, 1]} : vector<16x128xf32> to vector<8x128xf32>
    %c0_12 = arith.constant 0 : index
    %c0_13 = arith.constant 0 : index
    %c0_14 = arith.constant 0 : index
    %14 = vector.load %arg4[%c0_12, %c0_13, %c0_14] : memref<1x8x128xf32, #tpu.memory_space<vmem>>, vector<1x8x128xf32>
    %15 = vector.shape_cast %14 : vector<1x8x128xf32> to vector<8x128xf32>
    %16 = vector.shape_cast %13 : vector<8x128xf32> to vector<1x8x128xf32>
    tpu.vector_store %arg4[%c0_12, %c0_13, %c0_14], %16 {strides = array<i32>} : memref<1x8x128xf32, #tpu.memory_space<vmem>>, vector<1x8x128xf32>,
    %17 = vector.extract_strided_slice %12 {offsets = [8, 0], sizes = [8, 128], strides = [1, 1]} : vector<16x128xf32> to vector<8x128xf32>
    %c0_15 = arith.constant 0 : index
    %c0_16 = arith.constant 0 : index
    %c0_17 = arith.constant 0 : index
    %18 = vector.load %arg5[%c0_15, %c0_16, %c0_17] : memref<1x8x128xf32, #tpu.memory_space<vmem>>, vector<1x8x128xf32>
    %19 = vector.shape_cast %18 : vector<1x8x128xf32> to vector<8x128xf32>
    %20 = vector.shape_cast %17 : vector<8x128xf32> to vector<1x8x128xf32>
    tpu.vector_store %arg5[%c0_15, %c0_16, %c0_17], %20 {strides = array<i32>} : memref<1x8x128xf32, #tpu.memory_space<vmem>>, vector<1x8x128xf32>,
    return
  }
  func.func @transform_0(%arg0: i32, %arg1: i32) -> (i32, i32, i32, i32) {
    %c0_i32 = arith.constant 0 : i32
    %c0_i32_0 = arith.constant 0 : i32
    %c0_i32_1 = arith.constant 0 : i32
    return %arg0, %arg1, %c0_i32, %c0_i32_0 : i32, i32, i32, i32
  }
  func.func @transform_1(%arg0: i32, %arg1: i32) -> (i32, i32) {
    %c0_i32 = arith.constant 0 : i32
    %c0_i32_0 = arith.constant 0 : i32
    %c0_i32_1 = arith.constant 0 : i32
    return %c0_i32, %c0_i32_0 : i32, i32
  }
  func.func @transform_2(%arg0: i32, %arg1: i32) -> (i32, i32, i32) {
    %c0_i32 = arith.constant 0 : i32
    %c0_i32_0 = arith.constant 0 : i32
    return %arg0, %c0_i32, %arg1 : i32, i32, i32
  }
  func.func @transform_3(%arg0: i32, %arg1: i32) -> (i32, i32, i32) {
    %c0_i32 = arith.constant 0 : i32
    %c0_i32_0 = arith.constant 0 : i32
    return %arg0, %c0_i32, %arg1 : i32, i32, i32
  }
}

</mosaic_0001>

<bundles_post_ra>
// kernel: tpu_custom_call.1
= control target key start
LH: loop header
LB: loop body
LE: loop exit
PB: predicated region body
PF: predicated region fallthrough
CT: control target
= control target key end

     0   :  { %9 = vsyncpa [#allocation4], 0  ;;  %s956_s0 = inlined_call_operand.hbm [shape: f32[2,1,4,132], index: 0, kind: input, shape index: {}]   ;;  %s957_s1 = inlined_call_operand.hbm [shape: f32[16,16], index: 1, kind: input, shape index: {}]   ;;  %s958_s2 = inlined_call_operand.hbm [shape: f32[2,8,128], index: 2, kind: output, shape index: {0}]   ;;  %s959_s3 = inlined_call_operand.hbm [shape: f32[2,8,128], index: 3, kind: output, shape index: {1}]  }
   0x1   :  { %11 = vsyncpa [#allocation4 + $0x1], 0 }
   0x2   :  { %12 = vsyncpa [#allocation7], 0 }
   0x3   :  { %13 = vsyncpa [#allocation5], 0 }
   0x4   :  { %15 = vsyncpa [#allocation5 + $0x1], 0 }
   0x5   :  { %16 = vsyncpa [#allocation10], 0 }
   0x6   :  { %18 = vsyncpa [#allocation10 + $0x1], 0  ;;  %s785_s12 = smov 0   ;;  %s787_s13 = smov 0  }
   0x7   :  { %s789_s14 = smov 0   ;;  %s791_s15 = smov 0  }
   0x8   :  { %s793_s16 = smov 0   ;;  %s795_s17 = smov 0  }
   0x9 LB: > { %s472_s18 = sadd.s32 4294967295, %s757_s17   ;;  %p474_p0 = scmp.ge.s32.totalorder %s757_s17, 1  ;;  %s757_s17 = sphi %s795_s17, %s24_s17   ;;  %s753_s16 = sphi %s793_s16, %s970_s16   ;;  %s749_s15 = sphi %s791_s15, %s969_s15   ;;  %s745_s14 = sphi %s789_s14, %s968_s14   ;;  %s741_s13 = sphi %s787_s13, %s967_s13   ;;  %s737_s12 = sphi %s785_s12, %s966_s12  }
   0xa   : > { %p817_p1 = scmp.eq.s32.totalorder %s472_s18, 0  ;;  %p146_p2 = scmp.lt.s32.totalorder %s757_s17, 3 }
   0xb   : > { %s157_s22 = sshll.u32 %s957_s1, 4  ;;  %s759_s24 = smov [#allocation6]   ;;  %s158_s22 = int_to_ptr.hbm [resolvable:$true] %s157_s22 }
   0xc   : > { %p825_p3 = pnand %p474_p0, %p146_p2  ;;  %s159_s25 = sshll.u32 %s759_s24, 4  ;;  %s160_s25 = int_to_ptr.vmem [resolvable:$true] %s159_s25 }
   0xd   : > { %p476_p6 = scmp.ge.s32.totalorder %s757_s17, 2  ;;  %s760_s26 = smov 128  }
   0xe   : > { %p506_p4 = pneg %p825_p3  ;;  %s761_s27 = smov 8  }
   0xf   : > { %s473_s28 = sadd.s32 4294967294, %s757_s17   ;;  %s36_s29 = sadd.s32 1, %s753_s16 }
  0x10   : > { %p507_p5 = pnand %p506_p4, %p817_p1  ;;  %s45_s30 = sadd.s32 1, %s745_s14 }
  0x11   : > { %p38_p7 = scmp.ge.s32.totalorder %s36_s29, 2  ;;  %p52_p8 = scmp.ne.s32.totalorder %s745_s14, %s741_s13 }
  0x12   : > { %509 = dma.hbm_to_vmem [thread:$0]  (!%p507_p5), %s158_s22, 256, %s160_s25, [#allocation7], %s760_s26, %s760_s26, %s761_s27  }
  0x13   : > { %p53_p9 = scmp.eq.s32.totalorder %s757_s17, 0  ;;  %p58_p10 = scmp.ne.s32.totalorder %s741_s13, %s737_s12 }
  0x14   : > { %s972_s29 = smov (%p38_p7, %s36_s29), 0  ;;  %p105_p13 = scmp.eq.s32.totalorder %s472_s18, 1 }
  0x15   : > { %p844_p11 = por %p53_p9, %p52_p8  ;;  %p850_p12 = por %p817_p1, %p58_p10 }
  0x16   : > { %s40_s6 = ssub.s32 %s753_s16, %s972_s29  ;;  %p111_p2 = scmp.eq.s32.totalorder %s473_s28, 1 }
  0x17   : > { %p43_p0 = scmp.eq.s32.totalorder %s40_s6, 0  ;;  %p856_p4 = por %p105_p13, %p52_p8 }
  0x18   : > { %p522_p5 = scmp.lt.s32.totalorder %s757_s17, 2  ;;  %p864_p7 = por %p111_p2, %p58_p10 }
  0x19   : > { %s862_s8 = scalar_select %p43_p0, %s745_s14, %s45_s30  }
  0x1a   : > { %s173_s10 = sand.u32 1, %s745_s14   ;;  %s493_s20 = sshll.u32 %s753_s16, 3 }
  0x1b   : > { %s477_s11 = sshll.u32 %s173_s10, 3  ;;  %s184_s18 = scalar_lea.hbm %s956_s0, %s493_s20 }
  0x1c   : > { %s177_s24 = scalar_lea.vmem [#allocation3], %s477_s11  ;;  %s186_s26 = sshll.u32 %s184_s18, 4  ;;  %s187_s26 = int_to_ptr.hbm [resolvable:$true] %s186_s26 }
  0x1d   : > { %s188_s25 = sshll.u32 %s177_s24, 4  ;;  %p511_p8 = pnand %p522_p5, %p844_p11  ;;  %s189_s25 = int_to_ptr.vmem [resolvable:$true] %s188_s25 }
  0x1e   : > { %s174_s27 = scalar_lea.sflag [#allocation4], %s173_s10  ;;  %197 = sbr.rel (%p825_p3) target bundleno = 340 (0x154), region = 28 }
  0x1f   : > { %513 = dma.hbm_to_vmem [thread:$0]  (!%p511_p8), %s187_s26, 128, %s189_s25, %s174_s27  }
  0x20   : > { %s878_s28 = sand.u32 (!%p825_p3), 1, %s741_s13  }
  0x21   : > { %s881_s30 = sshll.u32 (!%p825_p3), %s878_s28, 3  ;;  %s200_s6 = scalar_lea.sflag (!%p825_p3), [#allocation4], %s878_s28 }
  0x22   : > { %s203_s11 = scalar_lea.vmem (!%p825_p3), [#allocation3], %s881_s30 }
  0x23   : > { %720 = dma.done.wait (%p850_p12), %s200_s6, 128  }
  0x24   : > { %722 = vsyncadd (%p850_p12), %s200_s6, 4294967168 }
  0x25   : > { %724 = dma.done.wait (%p817_p1), [#allocation7], 256  }
  0x26   : > { %726 = vsyncadd (%p817_p1), [#allocation7], 4294967040  ;;  %v237_v0 = vld [vmem:[%s203_s11] sm:$0xff]  ;;  %s762_s23 = smov 127   ;;  %s763_s4 = smov 126   ;;  %vm247_vm0 = vcmask 1039360  }
  0x27   : > { %240 = vst [vmem:[#allocation1] ss:$2 sm:$0xff] %v237_v0  ;;  %s764_s5 = smov 125   ;;  %vm258_vm1 = vcmask 1031168   ;;  %vm269_vm2 = vcmask 1022976   ;;  %v273_v17 = vld [vmem:[#allocation6] sm:$0xff] }
  0x28   : > { %238 = vst [vmem:[#allocation2] sm:$0xf] %v237_v0  ;;  %vm277_vm3 = vcmask 130048   ;;  %v274_v18 = vld [vmem:[#allocation6 + $0x8] sm:$0xff]  ;;  %s489_s19 = sshll.u32 %s749_s15, 3  ;;  %s229_s25 = scalar_lea.vmem [#allocation8], %s881_s30 }
  0x29   : > { %s326_s21 = scalar_lea.hbm %s958_s2, %s489_s19  ;;  %s341_s24 = scalar_lea.hbm %s959_s3, %s489_s19 }
  0x2a   : > { %s328_s26 = sshll.u32 %s229_s25, 4  ;;  %s236_s27 = scalar_lea.vmem [#allocation9], %s881_s30  ;;  %s329_s26 = int_to_ptr.vmem [resolvable:$true] %s328_s26 }
  0x2b   : > { %s902_s6 = sshll.u32 %s236_s27, 4  ;;  %s330_s11 = sshll.u32 %s326_s21, 4  ;;  %s344_s6 = int_to_ptr.vmem [resolvable:$true] %s902_s6  ;;  %s331_s11 = int_to_ptr.hbm [resolvable:$true] %s330_s11 }
  0x2c   : > { %s310_s15 = scalar_lea.sflag [#allocation5], %s878_s28  ;;  %s659_s10 = scalar_lea.hbm %s958_s2, 16 }
  0x2e   : > { %v241_v1 = vld.sshfl [vmem:[#allocation1] sm:$0xff pattern:$0x75316420]  ;;  %v242_v2 = vld.sshfl [vmem:[#allocation1 + $0x8] sm:$0xff pattern:$0x75316420] }
  0x2f   : > { %251 = vst [vmem:[#allocation1] ss:$2 sm:$0xff] %v237_v0  ;;  %243 = vrot.lane.b32.xlu2 %v241_v1, %s762_s23 }
  0x36   : > { %v252_v3 = vld.sshfl [vmem:[#allocation1] sm:$0xff pattern:$0x75316420]  ;;  %v253_v4 = vld.sshfl [vmem:[#allocation1 + $0x8] sm:$0xff pattern:$0x75316420] }
  0x37   : > { %254 = vrot.lane.b32.xlu0 %v252_v3, %s763_s4  ;;  %262 = vst [vmem:[#allocation1] ss:$2 sm:$0xff] %v237_v0  ;;  %245 = vrot.lane.b32.xlu2 %v242_v2, %s762_s23  ;;  %s345_s23 = sshll.u32 %s341_s24, 4  ;;  %s905_s23 = int_to_ptr.hbm [resolvable:$true] %s345_s23 }
  0x3e   : > { %v263_v5 = vld.sshfl [vmem:[#allocation1] sm:$0xff pattern:$0x75316420]  ;;  %v264_v6 = vld.sshfl [vmem:[#allocation1 + $0x8] sm:$0xff pattern:$0x75316420] }
  0x3f   : > { %256 = vrot.lane.b32.xlu0 %v253_v4, %s763_s4  ;;  %265 = vrot.lane.b32.xlu1 %v263_v5, %s764_s5  ;;  %s653_s4 = sshra.s32 %s331_s11, 4  ;;  %s654_s4 = int_to_ptr.hbm [resolvable:$true] %s653_s4 }
  0x40   : > { %p660_p10 = scmp.lt.s32.totalorder %s654_s4, %s958_s2 }
  0x47   : > { %267 = vrot.lane.b32.xlu1 %v264_v6, %s764_s5  ;;  %s655_s5 = scalar_lea.hbm %s654_s4, 8 }
  0x48   : > { %p656_p1 = scmp.ne.s32.totalorder %s654_s4, %s655_s5  ;;  %p661_p11 = scmp.lt.s32.totalorder %s659_s10, %s655_s5 }
  0x4a   : > { %p657_p3 = pnand %p656_p1, %p856_p4  ;;  %p662_p12 = por %p661_p11, %p660_p10 }
  0x4c   : > { %p658_p9 = pneg %p657_p3 }
  0x4e   : > { %p663_p13 = pnand %p662_p12, %p658_p9 }
  0x89   : > { %v244_v7 = vpop.permute.xlu2 %243 }
  0x91   : > { %v246_v8 = vpop.permute.xlu2 %245 }
  0x92   : > { %v248_v9 = vsel %vm247_vm0, %v244_v7, %v246_v8 }
  0x93   : > { %250 = vst [vmem:[#allocation2 + $0x4] sm:$0xf] %v248_v9 }
  0x9a   : > { %v275_v19 = vld [vmem:[#allocation2] sm:$0xff] }
  0xa9   : > { %v255_v10 = vpop.permute.xlu0 %254 }
  0xb1   : > { %v257_v11 = vpop.permute.xlu0 %256  ;;  %v266_v12 = vpop.permute.xlu1 %265 }
  0xb2   : > { %v259_v13 = vsel %vm258_vm1, %v255_v10, %v257_v11 }
  0xb3   : > { %261 = vst [vmem:[#allocation2 + $0x8] sm:$0xf] %v259_v13 }
  0xb9   : > { %v268_v14 = vpop.permute.xlu1 %267 }
  0xba   : > { %v270_v15 = vsel %vm269_vm2, %v266_v12, %v268_v14 }
  0xbb   : > { %272 = vst [vmem:[#allocation2 + $0xc] sm:$0xf] %v270_v15 }
  0xc2   : > { %v276_v16 = vld [vmem:[#allocation2 + $0x8] sm:$0xff] }
  0xc3   : > { %298 = vmatpush.msra.mxu0 %v276_v16  ;;  %494 = vmatpush.msra.mxu1 %v276_v16 }
  0xc5   : > { %299 = vmatpush.msra.mxu0 %v275_v19  ;;  %495 = vmatpush.msra.mxu1 %v275_v19 }
  0xc6   : > { %485 = vmatmul.msk.f32.vlgmr.msra.gmra.mxu0 %vm277_vm3, %v273_v17  ;;  %486 = vmatmul.msk.f32.vlgmr.msra.gmra.mxu1 %vm277_vm3, %v274_v18 }
 0x143   : > { %v301_v20 = vpop.f32.mrf.mxu0  ;;  %v304_v21 = vpop.f32.mrf.mxu1 }
 0x144   : > { %307 = vst [vmem:[%s229_s25] sm:$0xff] %v301_v20 }
 0x145   : > { %308 = vst [vmem:[%s236_s27] sm:$0xff] %v304_v21 }
 0x146   : > { %666 = shalt.err (!%p663_p13)
}
 0x147   : > { %502 = dma.vmem_to_hbm [thread:$0]  (%p856_p4), %s329_s26, 128, %s331_s11, %s310_s15  }
 0x148   : > { %s315_s22 = scalar_lea.sflag [#allocation10], %s878_s28  ;;  %s681_s18 = sshra.s32 %s905_s23, 4  ;;  %s682_s18 = int_to_ptr.hbm [resolvable:$true] %s681_s18 }
 0x149   : > { %s683_s24 = scalar_lea.hbm %s682_s18, 8  ;;  %s687_s4 = scalar_lea.hbm %s959_s3, 16 }
 0x14a   : > { %p684_p0 = scmp.ne.s32.totalorder %s682_s18, %s683_s24  ;;  %p688_p8 = scmp.lt.s32.totalorder %s682_s18, %s959_s3 }
 0x14b   : > { %p689_p1 = scmp.lt.s32.totalorder %s687_s4, %s683_s24 }
 0x14c   : > { %p685_p2 = pnand %p684_p0, %p856_p4 }
 0x14d   : > { %p690_p3 = por %p689_p1, %p688_p8 }
 0x14e   : > { %p686_p5 = pneg %p685_p2 }
 0x150   : > { %p691_p9 = pnand %p690_p3, %p686_p5 }
 0x152   : > { %694 = shalt.err (!%p691_p9)
}
 0x153   : > { %503 = dma.vmem_to_hbm [thread:$0]  (%p856_p4), %s344_s6, 128, %s905_s23, %s315_s22  }
 0x154 PF: > { %s357_s28 = sand.u32 1, %s737_s12   ;;  %p515_p10 = pnand %p476_p6, %p864_p7 }
 0x155   : > { %s358_s26 = scalar_lea.sflag [#allocation5], %s357_s28 }
 0x156   : > { %p516_p11 = pneg %p515_p10 }
 0x158   : > { %728 = dma.done.wait (%p516_p11), %s358_s26, 128  }
 0x159   : > { %730 = vsyncadd (%p516_p11), %s358_s26, 4294967168  ;;  %s368_s11 = scalar_lea.sflag [#allocation10], %s357_s28 }
 0x15a   : > { %732 = dma.done.wait (%p516_p11), %s368_s11, 128  }
 0x15b   : > { %734 = vsyncadd (%p516_p11), %s368_s11, 4294967168  ;;  %s24_s17 = sadd.s32 1, %s757_s17   ;;  %s966_s12 = smov %s741_s13 }
 0x15c   : > { %p21_p12 = scmp.ge.s32.totalorder %s24_s17, 4   ;;  %s967_s13 = smov %s745_s14 }
 0x15d   : > { %s968_s14 = smov %s862_s8  ;;  %s969_s15 = smov %s753_s16 }
 0x15e   : > { %s970_s16 = smov %s972_s29  ;;  %23 = sbr.rel (!%p21_p12) target bundleno = 9 (0x9), region = 94 }
 0x163   :  { %374 = vsyncpa [#allocation4], 1 }
 0x164   :  { %376 = vsyncpa [#allocation4 + $0x1], 1 }
 0x165   :  { %377 = vsyncpa [#allocation7], 1 }
 0x166   :  { %378 = vsyncpa [#allocation5], 1 }
 0x167   :  { %380 = vsyncpa [#allocation5 + $0x1], 1 }
 0x168   :  { %381 = vsyncpa [#allocation10], 1 }
 0x169   :  { %383 = vsyncpa [#allocation10 + $0x1], 1 }

</bundles_post_ra>
